<compile_context>
chip_gen: v5e
topology: v5e:2x2
jax: 0.10.0
libtpu: 0.0.40
codegen_flags: <defaults>
</compile_context>

<pallas_src>
import jax
import jax.numpy as jnp
from jax.experimental import pallas as pl
from jax.experimental.pallas import tpu as pltpu


def _round_up(a, b):
    return (a + b - 1) // b * b


# ----------------------------------------------------------------------------
# Fused kernel:  relu(x * scale + shift) @ W4   (BN + ReLU + conv1x1 + avgpool)
# ----------------------------------------------------------------------------
def _transition_kernel(x_ref, scale_ref, shift_ref, w_ref, o_ref):
    y = jnp.maximum(x_ref[...] * scale_ref[...] + shift_ref[...], 0.0)   # VPU
    o_ref[...] = jnp.dot(y, w_ref[...],
                         preferred_element_type=jnp.float32).astype(o_ref.dtype)


def transition_forward(params, x_nchw, *, eps=1e-5, tile_m_target=512):
    gamma = params["bn_gamma"].astype(jnp.float32)
    beta = params["bn_beta"].astype(jnp.float32)
    rmean = params["bn_mean"].astype(jnp.float32)
    rvar = params["bn_var"].astype(jnp.float32)
    w = params["conv_w"].astype(jnp.float32)            # (Cout, Cin, 1, 1)

    N, C, H, W = x_nchw.shape
    Cout = w.shape[0]
    assert H % 2 == 0 and W % 2 == 0
    Ho, Wo = H // 2, W // 2
    M = N * Ho * Wo
    K = 4 * C

    # ---- layout plumbing (XLA glue): one row per output pixel = its 2x2 window
    x = jnp.transpose(x_nchw.astype(jnp.float32), (0, 2, 3, 1))          # NHWC
    x = x.reshape(N, Ho, 2, Wo, 2, C).transpose(0, 1, 3, 2, 4, 5)
    x = x.reshape(M, K)                                                  # [M, 4*Cin]

    # ---- fold eval-mode BN into per-channel affine, replicated over 4 taps
    scale = gamma * jax.lax.rsqrt(rvar + eps)
    shift = beta - rmean * scale
    scale4 = jnp.tile(scale, 4).reshape(1, K)
    shift4 = jnp.tile(shift, 4).reshape(1, K)

    # ---- fold avg-pool (x0.25) into the 1x1 conv weight, replicate over taps
    wk = w.reshape(Cout, C).T * 0.25                                     # (Cin, Cout)
    w4 = jnp.tile(wk, (4, 1))                                            # (K, Cout)

    # ---- TPU tiling pads: K -> mult of 8, N -> mult of 128 (lane-dense out),
    #      M -> multiple of the tile.
    k_pad = _round_up(K, 8)
    n_pad = _round_up(max(Cout, 128), 128)
    tile_m = min(tile_m_target, _round_up(M, 8))
    m_pad = _round_up(M, tile_m)

    if k_pad != K:
        x = jnp.pad(x, ((0, 0), (0, k_pad - K)))
        scale4 = jnp.pad(scale4, ((0, 0), (0, k_pad - K)))
        shift4 = jnp.pad(shift4, ((0, 0), (0, k_pad - K)))
        w4 = jnp.pad(w4, ((0, k_pad - K), (0, 0)))
    if m_pad != M:
        x = jnp.pad(x, ((0, m_pad - M), (0, 0)))
    w4 = jnp.pad(w4, ((0, 0), (0, n_pad - Cout)))

    grid = (m_pad // tile_m,)
    cost = pl.CostEstimate(
        flops=2 * m_pad * k_pad * n_pad,
        transcendentals=0,
        bytes_accessed=4 * (m_pad * k_pad + k_pad * n_pad + 2 * k_pad
                            + m_pad * n_pad),
    )

    out = pl.pallas_call(
        _transition_kernel,
        out_shape=jax.ShapeDtypeStruct((m_pad, n_pad), jnp.float32),
        grid=grid,
        in_specs=[
            pl.BlockSpec((tile_m, k_pad), lambda i: (i, 0)),   # x tile (pipelined)
            pl.BlockSpec((1, k_pad), lambda i: (0, 0)),        # scale (resident)
            pl.BlockSpec((1, k_pad), lambda i: (0, 0)),        # shift (resident)
            pl.BlockSpec((k_pad, n_pad), lambda i: (0, 0)),    # W4    (resident)
        ],
        out_specs=pl.BlockSpec((tile_m, n_pad), lambda i: (i, 0)),
        compiler_params=pltpu.CompilerParams(
            dimension_semantics=("parallel",)),
        cost_estimate=cost,
    )(x, scale4, shift4, w4)

    out = out[:M, :Cout].reshape(N, Ho, Wo, Cout)
    return jnp.transpose(out, (0, 3, 1, 2))                              # NCHW


# ----------------------------------------------------------------------------
# Pure-JAX reference (mirrors the PyTorch forward op-for-op)
# ----------------------------------------------------------------------------
def transition_reference(params, x_nchw, *, eps=1e-5):
    gamma, beta = params["bn_gamma"], params["bn_beta"]
    rmean, rvar = params["bn_mean"], params["bn_var"]
    w = params["conv_w"]
    Cout, Cin = w.shape[0], w.shape[1]
    xb = (x_nchw - rmean[None, :, None, None]) * \
        jax.lax.rsqrt(rvar + eps)[None, :, None, None]
    xb = xb * gamma[None, :, None, None] + beta[None, :, None, None]
    y = jnp.maximum(xb, 0.0)
    z = jnp.einsum("nchw,oc->nohw", y, w.reshape(Cout, Cin))
    N, _, H, W = z.shape
    return z.reshape(N, Cout, H // 2, 2, W // 2, 2).mean(axis=(3, 5))


# ----------------------------------------------------------------------------
if __name__ == "__main__":
    inplanes, outplanes = 4, 8
    batch, H, W = 2, 16, 16

    key = jax.random.PRNGKey(0)
    k1, k2, k3, k4, k5, kx = jax.random.split(key, 6)
    bound = 1.0 / (inplanes ** 0.5)
    params = {
        "conv_w": jax.random.uniform(k1, (outplanes, inplanes, 1, 1),
                                     jnp.float32, -bound, bound),
        "bn_gamma": jax.random.uniform(k2, (inplanes,), jnp.float32, 0.5, 1.5),
        "bn_beta": jax.random.uniform(k3, (inplanes,), jnp.float32, -0.5, 0.5),
        "bn_mean": 0.1 * jax.random.normal(k4, (inplanes,), jnp.float32),
        "bn_var": jax.random.uniform(k5, (inplanes,), jnp.float32, 0.5, 1.5),
    }
    x = jax.random.normal(kx, (batch, inplanes, H, W), jnp.float32)

    fwd = jax.jit(transition_forward)
    out = jax.block_until_ready(fwd(params, x))

    assert out.shape == (batch, outplanes, H // 2, W // 2), out.shape
    assert bool(jnp.all(jnp.isfinite(out)))
    ref = transition_reference(params, x)
    max_err = float(jnp.max(jnp.abs(out - ref)))
    assert max_err < 1e-4, max_err
    print("KERNEL_OK")
</pallas_src>

<mosaic_0001>
module attributes {stable_mosaic.version = 11 : i64} {
  func.func @_transition_kernel(%arg0: i32, %arg1: memref<128x16xf32, #tpu.memory_space<vmem>>, %arg2: memref<1x16xf32, #tpu.memory_space<vmem>>, %arg3: memref<1x16xf32, #tpu.memory_space<vmem>>, %arg4: memref<16x128xf32, #tpu.memory_space<vmem>>, %arg5: memref<128x128xf32, #tpu.memory_space<vmem>>) attributes {dimension_semantics = [#tpu.dimension_semantics<parallel>], iteration_bounds = array<i64: 1>, scalar_prefetch = 0 : i64, scratch_operands = 0 : i64, tpu.core_type = #tpu.core_type<tc>, window_params = [{transform_indices = @transform_0, window_bounds = array<i64: 128, 16>}, {pipeline_mode = #tpu.pipeline_mode<synchronous>, transform_indices = @transform_1, window_bounds = array<i64: 1, 16>}, {pipeline_mode = #tpu.pipeline_mode<synchronous>, transform_indices = @transform_2, window_bounds = array<i64: 1, 16>}, {pipeline_mode = #tpu.pipeline_mode<synchronous>, transform_indices = @transform_3, window_bounds = array<i64: 16, 128>}, {transform_indices = @transform_4, window_bounds = array<i64: 128, 128>}]} {
    %c0 = arith.constant 0 : index
    %c0_0 = arith.constant 0 : index
    %0 = vector.load %arg1[%c0, %c0_0] : memref<128x16xf32, #tpu.memory_space<vmem>>, vector<128x16xf32>
    %c0_1 = arith.constant 0 : index
    %c0_2 = arith.constant 0 : index
    %1 = vector.load %arg2[%c0_1, %c0_2] : memref<1x16xf32, #tpu.memory_space<vmem>>, vector<1x16xf32>
    %2 = vector.broadcast %1 : vector<1x16xf32> to vector<128x16xf32>
    %3 = arith.mulf %0, %2 : vector<128x16xf32>
    %c0_3 = arith.constant 0 : index
    %c0_4 = arith.constant 0 : index
    %4 = vector.load %arg3[%c0_3, %c0_4] : memref<1x16xf32, #tpu.memory_space<vmem>>, vector<1x16xf32>
    %5 = vector.broadcast %4 : vector<1x16xf32> to vector<128x16xf32>
    %6 = arith.addf %3, %5 : vector<128x16xf32>
    %cst = arith.constant 0.000000e+00 : f32
    %7 = vector.broadcast %cst : f32 to vector<128x16xf32>
    %8 = arith.maximumf %6, %7 : vector<128x16xf32>
    %c0_5 = arith.constant 0 : index
    %c0_6 = arith.constant 0 : index
    %9 = vector.load %arg4[%c0_5, %c0_6] : memref<16x128xf32, #tpu.memory_space<vmem>>, vector<16x128xf32>
    %cst_7 = arith.constant dense<0.000000e+00> : vector<128x128xf32>
    %10 = tpu.matmul %8, %9, %cst_7 {dimension_numbers = #tpu.dot_dimension_numbers<[1], [0], [0], [1], [0, 0, 1, 1], [], []>} : vector<128x16xf32>, vector<16x128xf32>, vector<128x128xf32> -> vector<128x128xf32>
    %c0_8 = arith.constant 0 : index
    %c0_9 = arith.constant 0 : index
    %11 = vector.load %arg5[%c0_8, %c0_9] : memref<128x128xf32, #tpu.memory_space<vmem>>, vector<128x128xf32>
    tpu.vector_store %arg5[%c0_8, %c0_9], %10 {strides = array<i32>} : memref<128x128xf32, #tpu.memory_space<vmem>>, vector<128x128xf32>,
    return
  }
  func.func @transform_0(%arg0: i32) -> (i32, i32) {
    %c0_i32 = arith.constant 0 : i32
    %c0_i32_0 = arith.constant 0 : i32
    return %arg0, %c0_i32 : i32, i32
  }
  func.func @transform_1(%arg0: i32) -> (i32, i32) {
    %c0_i32 = arith.constant 0 : i32
    %c0_i32_0 = arith.constant 0 : i32
    %c0_i32_1 = arith.constant 0 : i32
    return %c0_i32, %c0_i32_0 : i32, i32
  }
  func.func @transform_2(%arg0: i32) -> (i32, i32) {
    %c0_i32 = arith.constant 0 : i32
    %c0_i32_0 = arith.constant 0 : i32
    %c0_i32_1 = arith.constant 0 : i32
    return %c0_i32, %c0_i32_0 : i32, i32
  }
  func.func @transform_3(%arg0: i32) -> (i32, i32) {
    %c0_i32 = arith.constant 0 : i32
    %c0_i32_0 = arith.constant 0 : i32
    %c0_i32_1 = arith.constant 0 : i32
    return %c0_i32, %c0_i32_0 : i32, i32
  }
  func.func @transform_4(%arg0: i32) -> (i32, i32) {
    %c0_i32 = arith.constant 0 : i32
    %c0_i32_0 = arith.constant 0 : i32
    return %arg0, %c0_i32 : i32, i32
  }
}

</mosaic_0001>

<bundles_post_ra>
// kernel: tile.18
= control target key start
LH: loop header
LB: loop body
LE: loop exit
PB: predicated region body
PF: predicated region fallthrough
CT: control target
= control target key end

     0   :  { %s22_s0 = inlined_call_operand.vmem [shape: f32[4], index: 0, kind: input, shape index: {}]   ;;  %s23_s1 = inlined_call_operand.vmem [shape: f32[4,4], index: 1, kind: output, shape index: {}]  }
   0x1   :  { %v4_v0 = vld [vmem:[%s22_s0] ss:$0 sm:$0xff] }
   0x2   :  { %5 = vst [vmem:[%s23_s1] sm:$0xf] %v4_v0 }

// kernel: tile.19
= control target key start
LH: loop header
LB: loop body
LE: loop exit
PB: predicated region body
PF: predicated region fallthrough
CT: control target
= control target key end

     0   :  { %s37_s8 = smov 4   ;;  %s38_s9 = smov 8   ;;  %vm7_vm0 = vcmask 31744   ;;  %vm13_vm1 = vcmask 130144   ;;  %vm19_vm2 = vcmask 97344   ;;  %vm25_vm3 = vcmask 64544   ;;  %s55_s0 = inlined_call_operand.vmem [shape: f32[4,4], index: 0, kind: input, shape index: {}]   ;;  %s56_s1 = inlined_call_operand.vmem [shape: f32[1,16], index: 1, kind: output, shape index: {}]  }
   0x1   :  { %v4_v0 = vld [vmem:[%s55_s0] sm:$0xf]  ;;  %s36_s0 = smov 12  }
   0x2   :  { %5 = vst [vmem:[#allocation1] sm:$0xf] %v4_v0 }
   0x9   :  { %v10_v1 = vld [vmem:[#allocation1 + $0x3] sm:$0x1]   ;;  %v22_v2 = vld [vmem:[#allocation1 + $0x1] sm:$0x1]   ;;  %v16_v3 = vld [vmem:[#allocation1 + $0x2] sm:$0x1]  }
   0xa   :  { %11 = vrot.lane.b32.xlu0 %v10_v1, %s36_s0  ;;  %23 = vrot.lane.b32.xlu1 %v22_v2, %s37_s8  ;;  %v6_v4 = vld [vmem:[#allocation1] sm:$0x1]  }
   0xb   :  { %8 = vst.msk [vmem:[#allocation0] sm:$0x1] %vm7_vm0, %v6_v4  }
  0x12   :  { %17 = vrot.lane.b32.xlu0 %v16_v3, %s38_s9 }
  0x7c   :  { %v12_v5 = vpop.permute.xlu0 %11   ;;  %v24_v6 = vpop.permute.xlu1 %23  }
  0x7d   :  { %14 = vst.msk [vmem:[#allocation0] sm:$0x1] %vm13_vm1, %v12_v5  }
  0x84   :  { %v18_v7 = vpop.permute.xlu0 %17  }
  0x85   :  { %20 = vst.msk [vmem:[#allocation0] sm:$0x1] %vm19_vm2, %v18_v7  }
  0x86   :  { %26 = vst.msk [vmem:[#allocation0] sm:$0x1] %vm25_vm3, %v24_v6  }
  0x8d   :  { %v29_v8 = vld [vmem:[#allocation0] sm:$0x1] }
  0x8e   :  { %32 = vst [vmem:[%s56_s1] sm:$0x1] %v29_v8 }

// kernel: transition_forward.1
= control target key start
LH: loop header
LB: loop body
LE: loop exit
PB: predicated region body
PF: predicated region fallthrough
CT: control target
= control target key end

     0   :  { %vm91_vm0 = vcmask 130048   ;;  %s434_s3 = inlined_call_operand.vmem [shape: f32[16,128], index: 3, kind: input, shape index: {}]   ;;  %s435_s0 = inlined_call_operand.vmem [shape: f32[128,16], index: 0, kind: input, shape index: {}]   ;;  %s436_s1 = inlined_call_operand.vmem [shape: f32[1,16], index: 1, kind: input, shape index: {}]   ;;  %s437_s2 = inlined_call_operand.vmem [shape: f32[1,16], index: 2, kind: input, shape index: {}]   ;;  %s438_s4 = inlined_call_operand.vmem [shape: f32[128,128], index: 4, kind: output, shape index: {}]  }
   0x1   :  { %v90_v0 = vld [vmem:[%s434_s3 + $0x8] sm:$0xff]  ;;  %v89_v1 = vld [vmem:[%s434_s3] sm:$0xff]  ;;  %v27_v32 = vld [vmem:[%s435_s0 + $0x50] sm:$0xff] }
   0x2   :  { %v25_v2 = vld [vmem:[%s435_s0 + $0x40] sm:$0xff]  ;;  %242 = vmatpush.msra.mxu2 %v90_v0  ;;  %243 = vmatpush.msra.mxu3 %v90_v0  ;;  %v26_v11 = vld [vmem:[%s435_s0 + $0x48] sm:$0xff]  ;;  %v31_v33 = vld [vmem:[%s435_s0 + $0x70] sm:$0xff] }
   0x3   :  { %v286_v3 = vld [vmem:[%s436_s1] ss:$0 sm:$0xff]  ;;  %154 = vmatpush.msra.mxu0 %v90_v0  ;;  %241 = vmatpush.msra.mxu1 %v90_v0  ;;  %v30_v12 = vld [vmem:[%s435_s0 + $0x68] sm:$0xff]  ;;  %v19_v34 = vld [vmem:[%s435_s0 + $0x10] sm:$0xff] }
   0x4   :  { %v291_v4 = vld [vmem:[%s437_s2] ss:$0 sm:$0xff]  ;;  %245 = vmatpush.msra.mxu2 %v89_v1  ;;  %246 = vmatpush.msra.mxu3 %v89_v1  ;;  %v45_v7 = vmul.f32 %v286_v3, %v25_v2  ;;  %v46_v14 = vmul.f32 %v286_v3, %v26_v11  ;;  %v18_v15 = vld [vmem:[%s435_s0 + $0x8] sm:$0xff]  ;;  %v50_v20 = vmul.f32 %v286_v3, %v30_v12  ;;  %v23_v35 = vld [vmem:[%s435_s0 + $0x30] sm:$0xff] }
   0x5   :  { %v29_v5 = vld [vmem:[%s435_s0 + $0x60] sm:$0xff]  ;;  %155 = vmatpush.msra.mxu0 %v89_v1  ;;  %244 = vmatpush.msra.mxu1 %v89_v1  ;;  %v22_v16 = vld [vmem:[%s435_s0 + $0x28] sm:$0xff]  ;;  %v38_v22 = vmul.f32 %v286_v3, %v18_v15  ;;  %v47_v38 = vmul.f32 %v286_v3, %v27_v32  ;;  %v51_v39 = vmul.f32 %v286_v3, %v31_v33  ;;  %v28_v48 = vld [vmem:[%s435_s0 + $0x58] sm:$0xff] }
   0x6   :  { %v17_v6 = vld [vmem:[%s435_s0] sm:$0xff]  ;;  %v49_v8 = vmul.f32 %v286_v3, %v29_v5  ;;  %v65_v17 = vadd.f32 %v291_v4, %v45_v7  ;;  %v42_v23 = vmul.f32 %v286_v3, %v22_v16  ;;  %v66_v28 = vadd.f32 %v291_v4, %v46_v14  ;;  %v32_v49 = vld [vmem:[%s435_s0 + $0x78] sm:$0xff] }
   0x7   :  { %v37_v9 = vmul.f32 %v286_v3, %v17_v6  ;;  %v21_v10 = vld [vmem:[%s435_s0 + $0x20] sm:$0xff]  ;;  %v70_v29 = vadd.f32 %v291_v4, %v50_v20  ;;  %v58_v30 = vadd.f32 %v291_v4, %v38_v22  ;;  %v39_v42 = vmul.f32 %v286_v3, %v19_v34  ;;  %v20_v50 = vld [vmem:[%s435_s0 + $0x18] sm:$0xff] }
   0x8   :  { %v41_v13 = vmul.f32 %v286_v3, %v21_v10  ;;  %v69_v18 = vadd.f32 %v291_v4, %v49_v8  ;;  %v81_v24 = vmax.f32 %v65_v17, 0.0  ;;  %v62_v31 = vadd.f32 %v291_v4, %v42_v23  ;;  %v24_v51 = vld [vmem:[%s435_s0 + $0x38] sm:$0xff] }
   0x9   :  { %v57_v19 = vadd.f32 %v291_v4, %v37_v9  ;;  %v82_v36 = vmax.f32 %v66_v28, 0.0  ;;  %v86_v37 = vmax.f32 %v70_v29, 0.0  ;;  %v74_v40 = vmax.f32 %v58_v30, 0.0 }
   0xa   :  { %v61_v21 = vadd.f32 %v291_v4, %v41_v13  ;;  %v85_v25 = vmax.f32 %v69_v18, 0.0  ;;  %233 = vmatmul.msk.f32.vlgmr.msra.gmra.mxu2 %vm91_vm0, %v81_v24  ;;  %v78_v41 = vmax.f32 %v62_v31, 0.0  ;;  %v43_v43 = vmul.f32 %v286_v3, %v23_v35 }
   0xb   :  { %v73_v26 = vmax.f32 %v57_v19, 0.0  ;;  %v67_v44 = vadd.f32 %v291_v4, %v47_v38  ;;  %v71_v45 = vadd.f32 %v291_v4, %v51_v39  ;;  %v59_v46 = vadd.f32 %v291_v4, %v39_v42 }
   0xc   :  { %v77_v27 = vmax.f32 %v61_v21, 0.0  ;;  %237 = vmatmul.msk.f32.vlgmr.msra.gmra.mxu3 %vm91_vm0, %v85_v25  ;;  %v63_v47 = vadd.f32 %v291_v4, %v43_v43  ;;  %v48_v54 = vmul.f32 %v286_v3, %v28_v48  ;;  %v52_v55 = vmul.f32 %v286_v3, %v32_v49 }
   0xd   :  { %225 = vmatmul.msk.f32.vlgmr.msra.gmra.mxu0 %vm91_vm0, %v73_v26  ;;  %v83_v52 = vmax.f32 %v67_v44, 0.0  ;;  %v87_v53 = vmax.f32 %v71_v45, 0.0  ;;  %v75_v56 = vmax.f32 %v59_v46, 0.0  ;;  %v40_v58 = vmul.f32 %v286_v3, %v20_v50 }
   0xe   :  { %229 = vmatmul.msk.f32.vlgmr.msra.gmra.mxu1 %vm91_vm0, %v77_v27  ;;  %v79_v57 = vmax.f32 %v63_v47, 0.0  ;;  %v44_v59 = vmul.f32 %v286_v3, %v24_v51  ;;  %v68_v60 = vadd.f32 %v291_v4, %v48_v54  ;;  %v72_v61 = vadd.f32 %v291_v4, %v52_v55 }
   0xf   :  { %v60_v62 = vadd.f32 %v291_v4, %v40_v58 }
  0x10   :  { %v64_v63 = vadd.f32 %v291_v4, %v44_v59  ;;  %v84_v0 = vmax.f32 %v68_v60, 0.0  ;;  %v88_v1 = vmax.f32 %v72_v61, 0.0 }
  0x11   :  { %v76_v2 = vmax.f32 %v60_v62, 0.0 }
  0x12   :  { %234 = vmatmul.msk.f32.gmra.mxu2 %vm91_vm0, %v82_v36  ;;  %v80_v3 = vmax.f32 %v64_v63, 0.0 }
  0x14   :  { %238 = vmatmul.msk.f32.gmra.mxu3 %vm91_vm0, %v86_v37 }
  0x15   :  { %226 = vmatmul.msk.f32.gmra.mxu0 %vm91_vm0, %v74_v40 }
  0x16   :  { %230 = vmatmul.msk.f32.gmra.mxu1 %vm91_vm0, %v78_v41 }
  0x1a   :  { %235 = vmatmul.msk.f32.gmra.mxu2 %vm91_vm0, %v83_v52 }
  0x1c   :  { %239 = vmatmul.msk.f32.gmra.mxu3 %vm91_vm0, %v87_v53 }
  0x1d   :  { %227 = vmatmul.msk.f32.gmra.mxu0 %vm91_vm0, %v75_v56 }
  0x1e   :  { %231 = vmatmul.msk.f32.gmra.mxu1 %vm91_vm0, %v79_v57 }
  0x22   :  { %236 = vmatmul.msk.f32.gmra.mxu2 %vm91_vm0, %v84_v0 }
  0x24   :  { %240 = vmatmul.msk.f32.gmra.mxu3 %vm91_vm0, %v88_v1 }
  0x25   :  { %228 = vmatmul.msk.f32.gmra.mxu0 %vm91_vm0, %v76_v2 }
  0x26   :  { %232 = vmatmul.msk.f32.gmra.mxu1 %vm91_vm0, %v80_v3 }
  0x8a   :  { %v157_v5 = vpop.f32.mrf.mxu0 }
  0x8b   :  { %v169_v6 = vpop.f32.mrf.mxu1  ;;  %205 = vst [vmem:[%s438_s4] sm:$0xff] %v157_v5 }
  0x8c   :  { %209 = vst [vmem:[%s438_s4 + $0x20] sm:$0xff] %v169_v6 }
  0x8d   :  { %v181_v4 = vpop.f32.mrf.mxu2 }
  0x8e   :  { %213 = vst [vmem:[%s438_s4 + $0x40] sm:$0xff] %v181_v4 }
  0x8f   :  { %v193_v7 = vpop.f32.mrf.mxu3 }
  0x90   :  { %217 = vst [vmem:[%s438_s4 + $0x60] sm:$0xff] %v193_v7 }
  0x92   :  { %v160_v8 = vpop.f32.mrf.mxu0 }
  0x93   :  { %v172_v9 = vpop.f32.mrf.mxu1  ;;  %206 = vst [vmem:[%s438_s4 + $0x8] sm:$0xff] %v160_v8 }
  0x94   :  { %210 = vst [vmem:[%s438_s4 + $0x28] sm:$0xff] %v172_v9 }
  0x95   :  { %v184_v10 = vpop.f32.mrf.mxu2 }
  0x96   :  { %214 = vst [vmem:[%s438_s4 + $0x48] sm:$0xff] %v184_v10 }
  0x97   :  { %v196_v11 = vpop.f32.mrf.mxu3 }
  0x98   :  { %218 = vst [vmem:[%s438_s4 + $0x68] sm:$0xff] %v196_v11 }
  0x9a   :  { %v163_v12 = vpop.f32.mrf.mxu0 }
  0x9b   :  { %v175_v13 = vpop.f32.mrf.mxu1  ;;  %207 = vst [vmem:[%s438_s4 + $0x10] sm:$0xff] %v163_v12 }
  0x9c   :  { %211 = vst [vmem:[%s438_s4 + $0x30] sm:$0xff] %v175_v13 }
  0x9d   :  { %v187_v14 = vpop.f32.mrf.mxu2 }
  0x9e   :  { %215 = vst [vmem:[%s438_s4 + $0x50] sm:$0xff] %v187_v14 }
  0x9f   :  { %v199_v15 = vpop.f32.mrf.mxu3 }
  0xa0   :  { %219 = vst [vmem:[%s438_s4 + $0x70] sm:$0xff] %v199_v15 }
  0xa2   :  { %v166_v16 = vpop.f32.mrf.mxu0 }
  0xa3   :  { %v178_v17 = vpop.f32.mrf.mxu1  ;;  %208 = vst [vmem:[%s438_s4 + $0x18] sm:$0xff] %v166_v16 }
  0xa4   :  { %212 = vst [vmem:[%s438_s4 + $0x38] sm:$0xff] %v178_v17 }
  0xa5   :  { %v190_v18 = vpop.f32.mrf.mxu2 }
  0xa6   :  { %216 = vst [vmem:[%s438_s4 + $0x58] sm:$0xff] %v190_v18 }
  0xa7   :  { %v202_v19 = vpop.f32.mrf.mxu3 }
  0xa8   :  { %220 = vst [vmem:[%s438_s4 + $0x78] sm:$0xff] %v202_v19 }

</bundles_post_ra>
